<compile_context>
chip_gen: v6e
topology: v6e:2x2x1
jax: 0.10.0
libtpu: 0.0.40
codegen_flags: <defaults>
</compile_context>

<pallas_src>
import jax
import jax.numpy as jnp
from jax import lax
from jax.experimental import pallas as pl
from jax.experimental.pallas import tpu as pltpu

BN_EPS = 1e-5
LEAKY_SLOPE = 0.01


def _round_up(x, m):
    return (x + m - 1) // m * m


def _cdiv(a, b):
    return -(-a // b)


def _near_equal_split(total, max_tile, align):
    """Split `total` into near-equal tiles (multiples of `align`, <= max_tile).
    Returns (tile, num_tiles, padded_total)."""
    total_a = _round_up(max(total, align), align)
    max_tile = max(align, min(_round_up(max_tile, align), total_a))
    num = _cdiv(total_a, max_tile)
    tile = _round_up(_cdiv(total_a, num), align)
    return tile, num, tile * num


def _footprint(tn, tk, to, isize, osize, with_acc):
    """True double-buffered VMEM bytes for one grid step."""
    fp = (2 * tn * tk * isize        # x tiles (double-buffered)
          + 2 * tk * to * isize      # folded W^T tiles
          + 2 * to * 4               # folded bias (f32)
          + 2 * tn * to * osize)     # output tiles
    if with_acc:
        fp += tn * to * 4            # f32 accumulator scratch (single-buffered)
    return fp


def _fit_budget(tn, tk, to, isize, osize, budget, sublane):
    """Shrink tile targets (out -> K -> rows -> out -> K -> rows) until the
    double-buffered footprint fits `budget`."""
    def fits(a, b, c):
        return _footprint(a, b, c, isize, osize, True) <= budget
    while not fits(tn, tk, to) and to > 512:
        to = _round_up(to // 2, 128)
    while not fits(tn, tk, to) and tk > 512:
        tk = _round_up(tk // 2, 128)
    while not fits(tn, tk, to) and tn > 4 * sublane:
        tn = _round_up(tn // 2, sublane)
    while not fits(tn, tk, to) and to > 128:
        to = _round_up(to // 2, 128)
    while not fits(tn, tk, to) and tk > 128:
        tk = _round_up(tk // 2, 128)
    while not fits(tn, tk, to) and tn > sublane:
        tn = _round_up(tn // 2, sublane)
    return tn, tk, to


def _gcn11_kernel_acc(x_ref, wt_ref, b_ref, o_ref, acc_ref):
    """K-tiled variant: f32 accumulator, bias+LeakyReLU epilogue on last K step."""
    k = pl.program_id(2)

    @pl.when(k == 0)
    def _():
        acc_ref[...] = jnp.zeros_like(acc_ref)

    acc_ref[...] += jnp.dot(x_ref[...], wt_ref[...],
                            preferred_element_type=jnp.float32)

    @pl.when(k == pl.num_programs(2) - 1)
    def _():
        y = acc_ref[...] + b_ref[...]
        o_ref[...] = jnp.maximum(y, LEAKY_SLOPE * y).astype(o_ref.dtype)


def _gcn11_kernel_single(x_ref, wt_ref, b_ref, o_ref):
    """Single-K-tile variant: no scratch, write straight to the output tile."""
    y = jnp.dot(x_ref[...], wt_ref[...],
                preferred_element_type=jnp.float32) + b_ref[...]
    o_ref[...] = jnp.maximum(y, LEAKY_SLOPE * y).astype(o_ref.dtype)


def gcn11_forward(x, gamma, beta, running_mean, running_var, weight, bias, *,
                  compute_dtype=None, max_tile_n=1024, max_tile_k=None,
                  max_tile_out=None):
    """x: (N, in_dim), weight: (out_dim, in_dim) as in nn.Linear.

    compute_dtype: dtype fed to the MXU (default: x.dtype). Pass jnp.bfloat16
    for f32 inputs when the accuracy budget allows (f32 accumulation is kept).
    """
    N, in_dim = x.shape
    out_dim = weight.shape[0]
    out_dtype = x.dtype
    compute_dtype = jnp.dtype(x.dtype if compute_dtype is None else compute_dtype)

    # ---- Fold BatchNorm (eval mode) into the Linear, once, in f32 ----
    scale = gamma.astype(jnp.float32) * lax.rsqrt(
        running_var.astype(jnp.float32) + BN_EPS)                    # (in_dim,)
    shift = beta.astype(jnp.float32) - running_mean.astype(jnp.float32) * scale
    w_f32 = weight.astype(jnp.float32)                               # (out_dim, in_dim)
    w_folded = w_f32 * scale[None, :]
    b_folded = bias.astype(jnp.float32) + w_f32 @ shift              # (out_dim,)

    wt = jnp.transpose(w_folded).astype(compute_dtype)               # (in_dim, out_dim)
    b2 = b_folded.reshape(1, out_dim)                                # keep f32
    x_c = x.astype(compute_dtype)

    isize = compute_dtype.itemsize
    osize = jnp.dtype(out_dtype).itemsize
    sublane = max(8, 32 // isize)        # 8 f32 / 16 bf16 / 32 int8: packing-aware

    # ---- VMEM budget: 75% of physical capacity (48 MiB v7x, 96 MiB v5e/v6e) ----
    try:
        vmem_cap = int(pltpu.get_tpu_info().vmem_capacity_bytes)
    except Exception:
        vmem_cap = 64 << 20              # conservative fallback
    budget = (vmem_cap * 3) // 4

    # ---- Tile selection (lane/sublane/MXU aligned, fitted to the budget) ----
    tgt_n = min(max_tile_n, _round_up(N, sublane))
    tgt_k = _round_up(in_dim, 128)
    if max_tile_k is not None:
        tgt_k = min(_round_up(max_tile_k, 128), tgt_k)
    tgt_o = _round_up(out_dim, 128)
    if max_tile_out is not None:
        tgt_o = min(_round_up(max_tile_out, 128), tgt_o)
    tgt_n, tgt_k, tgt_o = _fit_budget(tgt_n, tgt_k, tgt_o, isize, osize,
                                      budget, sublane)

    tile_n, nr, n_pad = _near_equal_split(N, tgt_n, sublane)
    tile_k, nk, k_pad = _near_equal_split(in_dim, tgt_k, 128)
    tile_out, nc, out_pad = _near_equal_split(out_dim, tgt_o, 128)

    # v7x has 2 TensorCores: make sure a "parallel" axis has >= 2 programs.
    if nr * nc == 1 and tile_n >= 2 * sublane:
        nr = 2
        tile_n = _round_up(_cdiv(n_pad, 2), sublane)
        n_pad = nr * tile_n

    # ---- Host-side zero padding (K / out zero-padding does not change results) ----
    x_c = jnp.pad(x_c, ((0, n_pad - N), (0, k_pad - in_dim)))
    wt = jnp.pad(wt, ((0, k_pad - in_dim), (0, out_pad - out_dim)))
    b2 = jnp.pad(b2, ((0, 0), (0, out_pad - out_dim)))

    # ---- Grid order: re-stream the cheaper operand ----
    x_bytes = n_pad * k_pad * isize
    w_bytes = k_pad * out_pad * isize
    rows_outer = (nr - 1) * w_bytes <= (nc - 1) * x_bytes
    if rows_outer:
        grid = (nr, nc, nk)
        x_map = lambda i, j, k: (i, k)
        wt_map = lambda i, j, k: (k, j)
        b_map = lambda i, j, k: (0, j)
        o_map = lambda i, j, k: (i, j)
    else:
        grid = (nc, nr, nk)
        x_map = lambda j, i, k: (i, k)
        wt_map = lambda j, i, k: (k, j)
        b_map = lambda j, i, k: (0, j)
        o_map = lambda j, i, k: (i, j)

    use_acc = nk > 1
    kernel = _gcn11_kernel_acc if use_acc else _gcn11_kernel_single
    scratch = [pltpu.VMEM((tile_n, tile_out), jnp.float32)] if use_acc else []

    fp = _footprint(tile_n, tile_k, tile_out, isize, osize, use_acc)
    vmem_limit = int(min(max(fp + fp // 4, 16 << 20), budget))

    out = pl.pallas_call(
        kernel,
        out_shape=jax.ShapeDtypeStruct((n_pad, out_pad), out_dtype),
        grid_spec=pltpu.PrefetchScalarGridSpec(
            num_scalar_prefetch=0,
            grid=grid,
            in_specs=[
                pl.BlockSpec((tile_n, tile_k), x_map),      # x tile
                pl.BlockSpec((tile_k, tile_out), wt_map),   # folded W^T tile
                pl.BlockSpec((1, tile_out), b_map),         # folded bias (f32)
            ],
            out_specs=pl.BlockSpec((tile_n, tile_out), o_map),
            scratch_shapes=scratch,
        ),
        compiler_params=pltpu.CompilerParams(
            dimension_semantics=("parallel", "parallel", "arbitrary"),
            vmem_limit_bytes=vmem_limit,
        ),
    )(x_c, wt, b2)

    return out[:N, :out_dim]


def gcn11_reference(x, gamma, beta, running_mean, running_var, weight, bias):
    xn = (x - running_mean) / jnp.sqrt(running_var + BN_EPS) * gamma + beta
    y = xn @ weight.T + bias
    return jnp.where(y > 0, y, LEAKY_SLOPE * y)


def _make_params(key, n, in_dim, out_dim):
    k = jax.random.split(key, 7)
    x = jax.random.normal(k[0], (n, in_dim), dtype=jnp.float32)
    gamma = 1.0 + 0.1 * jax.random.normal(k[1], (in_dim,), dtype=jnp.float32)
    beta = 0.1 * jax.random.normal(k[2], (in_dim,), dtype=jnp.float32)
    running_mean = 0.2 * jax.random.normal(k[3], (in_dim,), dtype=jnp.float32)
    running_var = jnp.abs(1.0 + 0.1 * jax.random.normal(k[4], (in_dim,),
                                                        dtype=jnp.float32))
    weight = jax.random.normal(k[5], (out_dim, in_dim),
                               dtype=jnp.float32) / jnp.sqrt(in_dim)
    bias = 0.05 * jax.random.normal(k[6], (out_dim,), dtype=jnp.float32)
    return x, gamma, beta, running_mean, running_var, weight, bias


if __name__ == "__main__":
    key = jax.random.PRNGKey(0)
    k_main, k_multi = jax.random.split(key, 2)

    # ---- 1) Primary small-shape check (f32, single-tile fast path) ----
    N, in_dim, out_dim = 8, 32, 16           # p = 0.0 -> dropout = identity
    args = _make_params(k_main, N, in_dim, out_dim)
    out = jax.block_until_ready(gcn11_forward(*args))
    ref = gcn11_reference(*args)
    assert out.shape == (N, out_dim)
    assert jnp.allclose(out, ref, atol=1e-4, rtol=1e-4), "f32 mismatch vs reference"

    # ---- 2) Multi-tile check: forces K-accumulation, padding, grid-order path ----
    N2, in2, out2 = 40, 384, 320
    args2 = _make_params(k_multi, N2, in2, out2)
    out2_v = jax.block_until_ready(
        gcn11_forward(*args2, max_tile_n=16, max_tile_k=128, max_tile_out=128))
    ref2 = gcn11_reference(*args2)
    assert out2_v.shape == (N2, out2)
    assert jnp.allclose(out2_v, ref2, atol=1e-3, rtol=1e-3), "tiled mismatch vs reference"

    # ---- 3) bf16 MXU feed (f32 accumulation), looser tolerance ----
    out_bf = jax.block_until_ready(
        gcn11_forward(*args, compute_dtype=jnp.bfloat16))
    assert out_bf.shape == (N, out_dim)
    assert jnp.allclose(out_bf, ref, atol=1.5e-1, rtol=1e-1), "bf16 mismatch vs reference"

    print("KERNEL_OK")
</pallas_src>

<mosaic_0001>
module attributes {stable_mosaic.version = 11 : i64} {
  func.func @_gcn11_kernel_single(%arg0: i32, %arg1: i32, %arg2: i32, %arg3: memref<8x128xf32, #tpu.memory_space<vmem>>, %arg4: memref<128x128xf32, #tpu.memory_space<vmem>>, %arg5: memref<1x128xf32, #tpu.memory_space<vmem>>, %arg6: memref<8x128xf32, #tpu.memory_space<vmem>>) attributes {dimension_semantics = [#tpu.dimension_semantics<parallel>, #tpu.dimension_semantics<parallel>, #tpu.dimension_semantics<arbitrary>], iteration_bounds = array<i64: 1, 1, 1>, scalar_prefetch = 0 : i64, scratch_operands = 0 : i64, tpu.core_type = #tpu.core_type<tc>, window_params = [{transform_indices = @transform_0, window_bounds = array<i64: 8, 128>}, {transform_indices = @transform_1, window_bounds = array<i64: 128, 128>}, {transform_indices = @transform_2, window_bounds = array<i64: 1, 128>}, {transform_indices = @transform_3, window_bounds = array<i64: 8, 128>}]} {
    %c0 = arith.constant 0 : index
    %c0_0 = arith.constant 0 : index
    %0 = vector.load %arg3[%c0, %c0_0] : memref<8x128xf32, #tpu.memory_space<vmem>>, vector<8x128xf32>
    %c0_1 = arith.constant 0 : index
    %c0_2 = arith.constant 0 : index
    %1 = vector.load %arg4[%c0_1, %c0_2] : memref<128x128xf32, #tpu.memory_space<vmem>>, vector<128x128xf32>
    %cst = arith.constant dense<0.000000e+00> : vector<8x128xf32>
    %2 = tpu.matmul %0, %1, %cst {dimension_numbers = #tpu.dot_dimension_numbers<[1], [0], [0], [1], [0, 0, 1, 1], [], []>} : vector<8x128xf32>, vector<128x128xf32>, vector<8x128xf32> -> vector<8x128xf32>
    %c0_3 = arith.constant 0 : index
    %c0_4 = arith.constant 0 : index
    %3 = vector.load %arg5[%c0_3, %c0_4] : memref<1x128xf32, #tpu.memory_space<vmem>>, vector<1x128xf32>
    %4 = vector.broadcast %3 : vector<1x128xf32> to vector<8x128xf32>
    %5 = arith.addf %2, %4 : vector<8x128xf32>
    %cst_5 = arith.constant 0.00999999977 : f32
    %6 = vector.broadcast %cst_5 : f32 to vector<8x128xf32>
    %7 = arith.mulf %6, %5 : vector<8x128xf32>
    %8 = arith.maximumf %5, %7 : vector<8x128xf32>
    %c0_6 = arith.constant 0 : index
    %c0_7 = arith.constant 0 : index
    %9 = vector.load %arg6[%c0_6, %c0_7] : memref<8x128xf32, #tpu.memory_space<vmem>>, vector<8x128xf32>
    tpu.vector_store %arg6[%c0_6, %c0_7], %8 {strides = array<i32>} : memref<8x128xf32, #tpu.memory_space<vmem>>, vector<8x128xf32>,
    return
  }
  func.func @transform_0(%arg0: i32, %arg1: i32, %arg2: i32) -> (i32, i32) {
    %c0_i32 = arith.constant 0 : i32
    return %arg0, %arg2 : i32, i32
  }
  func.func @transform_1(%arg0: i32, %arg1: i32, %arg2: i32) -> (i32, i32) {
    %c0_i32 = arith.constant 0 : i32
    return %arg2, %arg1 : i32, i32
  }
  func.func @transform_2(%arg0: i32, %arg1: i32, %arg2: i32) -> (i32, i32) {
    %c0_i32 = arith.constant 0 : i32
    %c0_i32_0 = arith.constant 0 : i32
    return %c0_i32, %arg1 : i32, i32
  }
  func.func @transform_3(%arg0: i32, %arg1: i32, %arg2: i32) -> (i32, i32) {
    %c0_i32 = arith.constant 0 : i32
    return %arg0, %arg1 : i32, i32
  }
}

</mosaic_0001>

<bundles_post_ra>
// kernel: tpu_custom_call.1
= control target key start
LH: loop header
LB: loop body
LE: loop exit
PB: predicated region body
PF: predicated region fallthrough
CT: control target
= control target key end

     0   :  { %8 = vsyncpa [#allocation3], 0  ;;  %s319_s0 = inlined_call_operand.hbm [shape: f32[8,128], index: 0, kind: input, shape index: {}]   ;;  %s320_s1 = inlined_call_operand.hbm [shape: f32[128,128], index: 1, kind: input, shape index: {}]   ;;  %s321_s2 = inlined_call_operand.vmem [shape: f32[1,128], index: 2, kind: input, shape index: {}]   ;;  %s322_s3 = inlined_call_operand.hbm [shape: f32[8,128], index: 3, kind: output, shape index: {}]  }
   0x1   :  { %9 = vsyncpa [#allocation6], 0 }
   0x2   :  { %10 = vsyncpa [#allocation4], 0  ;;  %s280_s12 = smov [#allocation2]   ;;  %s281_s14 = smov [#allocation5]  }
   0x3   :  { %s17_s13 = sshll.u32 %s280_s12, 4  ;;  %s26_s15 = sshll.u32 %s281_s14, 4  ;;  %s18_s13 = int_to_ptr.vmem [resolvable:$true] %s17_s13  ;;  %s27_s15 = int_to_ptr.vmem [resolvable:$true] %s26_s15 }
   0x4   :  { %s222_s16 = scalar_lea.vmem %s18_s13, 128  ;;  %p227_p1 = scmp.lt.s32.totalorder %s18_s13, %s18_s13 }
   0x5   :  { %p223_p0 = scmp.ne.s32.totalorder %s18_s13, %s222_s16  ;;  %p228_p2 = scmp.lt.s32.totalorder %s222_s16, %s222_s16 }
   0x7   :  { %p229_p3 = por %p228_p2, %p227_p1 }
   0x9   :  { %p230_p4 = pnand %p229_p3, %p223_p0 }
   0xb   :  { %233 = shalt.err (!%p230_p4)
}
   0xc   :  { %20 = dma.hbm_to_vmem [thread:$0]  %s319_s0, 128, %s18_s13, [#allocation3]  }
   0xd   :  { %s242_s19 = scalar_lea.vmem %s27_s15, 2048  ;;  %p247_p6 = scmp.lt.s32.totalorder %s27_s15, %s27_s15 }
   0xe   :  { %p243_p5 = scmp.ne.s32.totalorder %s27_s15, %s242_s19  ;;  %p248_p7 = scmp.lt.s32.totalorder %s242_s19, %s242_s19 }
  0x10   :  { %p249_p8 = por %p248_p7, %p247_p6 }
  0x12   :  { %p250_p9 = pnand %p249_p8, %p243_p5 }
  0x14   :  { %253 = shalt.err (!%p250_p9)
}
  0x15   :  { %s282_s20 = smov 128   ;;  %s283_s21 = smov 8  }
  0x16   :  { %32 = dma.hbm_to_vmem [thread:$0]  %s320_s1, 2048, %s27_s15, [#allocation6], %s282_s20, %s282_s20, %s283_s21  }
  0x17   :  { %274 = dma.done.wait [#allocation3], 128  }
  0x18   :  { %275 = vsyncadd [#allocation3], 4294967168 }
  0x19   :  { %276 = dma.done.wait [#allocation6], 2048  }
  0x1a   :  { %277 = vsyncadd [#allocation6], 4294965248  ;;  %v284_v0 = vmov 0.0   ;;  %vm285_vm0 = vmmov 0   ;;  %v57_v1 = vld [vmem:[#allocation5 + $0x78] sm:$0xff]  ;;  %v56_v2 = vld [vmem:[#allocation5 + $0x70] sm:$0xff] }
  0x1b   :  { %172 = vmatprep.subr.mxu0 %v284_v0  ;;  %204 = vmatprep.mubr.msk.f32.mxu0 %vm285_vm0, %v284_v0  ;;  %v55_v3 = vld [vmem:[#allocation5 + $0x68] sm:$0xff]  ;;  %v54_v4 = vld [vmem:[#allocation5 + $0x60] sm:$0xff]  ;;  %v53_v5 = vld [vmem:[#allocation5 + $0x58] sm:$0xff]  ;;  %s286_s24 = smov [#allocation7]  }
  0x1c   :  { %173 = vmatpush3.msra.mxu0 %v57_v1  ;;  %v52_v6 = vld [vmem:[#allocation5 + $0x50] sm:$0xff]  ;;  %v51_v7 = vld [vmem:[#allocation5 + $0x48] sm:$0xff]  ;;  %v50_v8 = vld [vmem:[#allocation5 + $0x40] sm:$0xff]  ;;  %s144_s25 = sshll.u32 %s286_s24, 4  ;;  %s145_s25 = int_to_ptr.vmem [resolvable:$true] %s144_s25 }
  0x1d   :  { %174 = vmatprep.subr.mxu0 %v284_v0  ;;  %v49_v9 = vld [vmem:[#allocation5 + $0x38] sm:$0xff]  ;;  %v48_v10 = vld [vmem:[#allocation5 + $0x30] sm:$0xff]  ;;  %v47_v11 = vld [vmem:[#allocation5 + $0x28] sm:$0xff]  ;;  %s254_s26 = scalar_lea.vmem %s145_s25, 128  ;;  %p259_p11 = scmp.lt.s32.totalorder %s145_s25, %s145_s25 }
  0x1e   :  { %175 = vmatpush3.msra.mxu0 %v56_v2  ;;  %v46_v12 = vld [vmem:[#allocation5 + $0x20] sm:$0xff]  ;;  %v45_v13 = vld [vmem:[#allocation5 + $0x18] sm:$0xff]  ;;  %v44_v14 = vld [vmem:[#allocation5 + $0x10] sm:$0xff]  ;;  %p255_p10 = scmp.ne.s32.totalorder %s145_s25, %s254_s26  ;;  %p260_p12 = scmp.lt.s32.totalorder %s254_s26, %s254_s26 }
  0x1f   :  { %176 = vmatprep.subr.mxu0 %v284_v0  ;;  %v43_v15 = vld [vmem:[#allocation5 + $0x8] sm:$0xff]  ;;  %v42_v16 = vld [vmem:[#allocation5] sm:$0xff]  ;;  %v41_v17 = vld [vmem:[#allocation2] sm:$0xff] }
  0x20   :  { %177 = vmatpush3.msra.mxu0 %v55_v3  ;;  %v154_v18 = vld [vmem:[%s321_s2] ss:$0 sm:$0xff]  ;;  %p261_p13 = por %p260_p12, %p259_p11 }
  0x21   :  { %178 = vmatprep.subr.mxu0 %v284_v0 }
  0x22   :  { %179 = vmatpush3.msra.mxu0 %v54_v4  ;;  %p262_p0 = pnand %p261_p13, %p255_p10 }
  0x23   :  { %180 = vmatprep.subr.mxu0 %v284_v0 }
  0x24   :  { %181 = vmatpush3.msra.mxu0 %v53_v5 }
  0x25   :  { %182 = vmatprep.subr.mxu0 %v284_v0 }
  0x26   :  { %183 = vmatpush3.msra.mxu0 %v52_v6 }
  0x27   :  { %184 = vmatprep.subr.mxu0 %v284_v0 }
  0x28   :  { %185 = vmatpush3.msra.mxu0 %v51_v7 }
  0x29   :  { %186 = vmatprep.subr.mxu0 %v284_v0 }
  0x2a   :  { %187 = vmatpush3.msra.mxu0 %v50_v8 }
  0x2b   :  { %188 = vmatprep.subr.mxu0 %v284_v0 }
  0x2c   :  { %189 = vmatpush3.msra.mxu0 %v49_v9 }
  0x2d   :  { %190 = vmatprep.subr.mxu0 %v284_v0 }
  0x2e   :  { %191 = vmatpush3.msra.mxu0 %v48_v10 }
  0x2f   :  { %192 = vmatprep.subr.mxu0 %v284_v0 }
  0x30   :  { %193 = vmatpush3.msra.mxu0 %v47_v11 }
  0x31   :  { %194 = vmatprep.subr.mxu0 %v284_v0 }
  0x32   :  { %195 = vmatpush3.msra.mxu0 %v46_v12 }
  0x33   :  { %196 = vmatprep.subr.mxu0 %v284_v0 }
  0x34   :  { %197 = vmatpush3.msra.mxu0 %v45_v13 }
  0x35   :  { %198 = vmatprep.subr.mxu0 %v284_v0 }
  0x36   :  { %199 = vmatpush3.msra.mxu0 %v44_v14 }
  0x37   :  { %200 = vmatprep.subr.mxu0 %v284_v0 }
  0x38   :  { %201 = vmatpush3.msra.mxu0 %v43_v15 }
  0x39   :  { %202 = vmatprep.subr.mxu0 %v284_v0 }
  0x3a   :  { %203 = vmatpush3.msra.mxu0 %v42_v16 }
  0x3b   :  { %205 = vmatmul.mubr.f32.vlgmr.msra.gmra.mxu0 %v41_v17 }
  0xfb   :  { %v131_v19 = vpop.f32.mrf.mxu0 }
  0xfc   :  { %v132_v20 = vadd.f32 %v154_v18, %v131_v19 }
  0xfd   :  { %v206_v21 = vpop.f32.mrf.mxu0 }
  0xfe   :  { %v135_v22 = vmul.f32 0.01, %v132_v20 }
 0x100   :  { %v136_v23 = vmax.f32 %v132_v20, %v135_v22 }
 0x102   :  { %137 = vst [vmem:[#allocation7] sm:$0xff] %v136_v23 }
 0x103   :  { %265 = shalt.err (!%p262_p0)
}
 0x104   :  { %147 = dma.vmem_to_hbm [thread:$0]  %s145_s25, 128, %s322_s3, [#allocation4]  }
 0x105   :  { %278 = dma.done.wait [#allocation4], 128  }
 0x106   :  { %279 = vsyncadd [#allocation4], 4294967168 }
 0x107   :  { %151 = vsyncpa [#allocation3], 1 }
 0x108   :  { %152 = vsyncpa [#allocation6], 1 }
 0x109   :  { %153 = vsyncpa [#allocation4], 1 }

</bundles_post_ra>
